<compile_context>
chip_gen: v7x
topology: tpu7x:2x2x1
jax: 0.10.0
libtpu: 0.0.40
codegen_flags: <defaults>
</compile_context>

<pallas_src>
import jax
import jax.numpy as jnp
from jax.experimental import pallas as pl
from jax.experimental.pallas import tpu as pltpu


def _round_up(x, m):
    return ((x + m - 1) // m) * m


# ----------------------------------------------------------------------------
# Small / single-block path: whole problem fits in one tile, no grid, no padding.
# ----------------------------------------------------------------------------
def _linear_hs_small_kernel(x_ref, w_ref, b_ref, o_ref):
    y = jnp.dot(x_ref[...], w_ref[...], preferred_element_type=jnp.float32)
    y = y + b_ref[...]                       # bias broadcast (1, N) over rows
    y = jnp.clip(y, 0.0, 6.0)                # clamp_min(0).clamp_max(6)
    o_ref[...] = y * (1.0 / 6.0) + 0.5       # (v + 3) / 6 as mul+add


def _linear_hs_small(x, w, b2d):
    M, K = x.shape
    N = w.shape[1]
    cost = pl.CostEstimate(
        flops=2 * M * N * K,
        transcendentals=0,
        bytes_accessed=4 * (M * K + K * N + N + M * N),
    )
    return pl.pallas_call(
        _linear_hs_small_kernel,
        out_shape=jax.ShapeDtypeStruct((M, N), jnp.float32),
        in_specs=[
            pl.BlockSpec((M, K), lambda: (0, 0)),
            pl.BlockSpec((K, N), lambda: (0, 0)),
            pl.BlockSpec((1, N), lambda: (0, 0)),
        ],
        out_specs=pl.BlockSpec((M, N), lambda: (0, 0)),
        cost_estimate=cost,
    )(x, w, b2d)


# ----------------------------------------------------------------------------
# General tiled path: bf16 MXU inputs, f32 VMEM accumulator, padded cdiv grid.
# ----------------------------------------------------------------------------
def _linear_hs_tiled_kernel(x_ref, w_ref, b_ref, o_ref, acc_ref):
    @pl.when(pl.program_id(2) == 0)
    def _():
        acc_ref[...] = jnp.zeros_like(acc_ref)

    acc_ref[...] += jnp.dot(
        x_ref[...], w_ref[...], preferred_element_type=jnp.float32
    )

    @pl.when(pl.program_id(2) == pl.num_programs(2) - 1)
    def _():
        y = acc_ref[...] + b_ref[...]        # runs once per (i, j) — keep out of k loop
        y = jnp.clip(y, 0.0, 6.0)
        o_ref[...] = (y * (1.0 / 6.0) + 0.5).astype(o_ref.dtype)


def _linear_hs_tiled(x, w, b2d, *, tm=512, tn=512, tk=512):
    M, K = x.shape
    N = w.shape[1]
    # Zero-pad every dim to a tile multiple; padded K rows/cols are zero so they
    # contribute nothing to the dot, padded M/N are sliced off at the end.
    Mp, Kp, Np = _round_up(M, tm), _round_up(K, tk), _round_up(N, tn)
    xb = jnp.pad(x, ((0, Mp - M), (0, Kp - K))).astype(jnp.bfloat16)
    wb = jnp.pad(w, ((0, Kp - K), (0, Np - N))).astype(jnp.bfloat16)
    bb = jnp.pad(b2d, ((0, 0), (0, Np - N)))          # bias stays f32
    gm, gn, gk = Mp // tm, Np // tn, Kp // tk

    cost = pl.CostEstimate(
        flops=2 * Mp * Np * Kp,
        transcendentals=0,
        # A is read gn times, B is read gm times (bf16 = 2 bytes), out + bias f32.
        bytes_accessed=2 * (Mp * Kp * gn + Kp * Np * gm) + 4 * (Mp * Np + Np),
    )
    out = pl.pallas_call(
        _linear_hs_tiled_kernel,
        out_shape=jax.ShapeDtypeStruct((Mp, Np), jnp.float32),
        grid_spec=pltpu.PrefetchScalarGridSpec(
            num_scalar_prefetch=0,
            grid=(gm, gn, gk),
            in_specs=[
                pl.BlockSpec((tm, tk), lambda i, j, k: (i, k)),
                # TODO(synk): on v5e consider pipeline_mode=pl.Buffered(3) here if
                # the B-tile DMA is exposed behind the longer f32-free matmul.
                pl.BlockSpec((tk, tn), lambda i, j, k: (k, j)),
                pl.BlockSpec((1, tn), lambda i, j, k: (0, j)),
            ],
            out_specs=pl.BlockSpec((tm, tn), lambda i, j, k: (i, j)),
            scratch_shapes=[pltpu.VMEM((tm, tn), jnp.float32)],
        ),
        compiler_params=pltpu.CompilerParams(
            # K-reduction last + "arbitrary"; M/N "parallel" so v7x's 2 TCs both
            # get blocks whenever gm*gn >= 2.
            dimension_semantics=("parallel", "parallel", "arbitrary"),
            vmem_limit_bytes=32 * 1024 * 1024,  # safe on v7x's 64 MiB physical VMEM
        ),
        cost_estimate=cost,
    )(xb, wb, bb)
    return out[:M, :N]


# ----------------------------------------------------------------------------
# Public wrapper: y = (clamp(x @ W + b, 0, 6) + 3) / 6
#   x: (M, K) f32, w: (K, N) f32 (PyTorch weight transposed), b: (N,) f32
# ----------------------------------------------------------------------------
@jax.jit
def model_forward(x, w, b):
    M, K = x.shape
    N = w.shape[1]
    b2d = b.reshape(1, N)
    # Whole problem comfortably fits one VMEM block -> single-block f32 kernel
    # (covers the shipped (1,12)x(12,12) case, where launch overhead dominates).
    if M <= 512 and N <= 512 and K <= 1024:
        return _linear_hs_small(x, w, b2d)
    # Big shapes: padded, bf16-input, 512-tile pipelined kernel (no divisibility
    # requirement on the caller's shapes).
    tm = 512 if M >= 512 else _round_up(M, 8)
    tn = 512 if N >= 512 else _round_up(N, 128)
    tk = 512 if K >= 512 else _round_up(K, 128)
    return _linear_hs_tiled(x, w, b2d, tm=tm, tn=tn, tk=tk)


if __name__ == "__main__":
    key = jax.random.PRNGKey(0)
    k_x, k_w, k_b = jax.random.split(key, 3)

    in_features, out_features = 12, 12
    batch = 1

    # Deterministic params (mimics torch.nn.Linear's U(-1/sqrt(fan_in), 1/sqrt(fan_in)))
    bound = 1.0 / (in_features ** 0.5)
    w_t = jax.random.uniform(k_w, (out_features, in_features), jnp.float32,
                             minval=-bound, maxval=bound)   # PyTorch layout (out, in)
    w = w_t.T                                               # kernel layout (in, out)
    b = jax.random.uniform(k_b, (out_features,), jnp.float32,
                           minval=-bound, maxval=bound)

    x1 = jax.random.normal(k_x, (batch, in_features), jnp.float32)

    out = model_forward(x1, w, b)
    jax.block_until_ready(out)

    # Reference: exactly the PyTorch forward's order of operations
    # (clamp_min(0).clamp_max(6), then +3, then /6 — NOT nn.Hardsigmoid).
    ref = (jnp.clip(x1 @ w + b, 0.0, 6.0) + 3.0) / 6.0
    assert out.shape == (batch, out_features)
    assert jnp.allclose(out, ref, atol=1e-5, rtol=1e-5)

    # Sanity-check the tiled (bf16-MXU, padded) path at a large ragged size.
    M2, K2, N2 = 1000, 1536, 640
    kx2, kw2, kb2 = jax.random.split(jax.random.PRNGKey(1), 3)
    x2 = jax.random.normal(kx2, (M2, K2), jnp.float32)
    w2 = jax.random.normal(kw2, (K2, N2), jnp.float32) * 0.05
    b2 = jax.random.normal(kb2, (N2,), jnp.float32)
    out2 = model_forward(x2, w2, b2)
    jax.block_until_ready(out2)
    ref2 = (jnp.clip(x2 @ w2 + b2, 0.0, 6.0) + 3.0) / 6.0
    assert out2.shape == (M2, N2)
    # Loose tolerance: kernel uses bf16 MXU inputs (f32 accumulation).
    assert jnp.allclose(out2, ref2, atol=2e-2, rtol=2e-2)

    print("KERNEL_OK")
</pallas_src>

<mosaic_0001>
module attributes {stable_mosaic.version = 11 : i64} {
  func.func @_linear_hs_small_kernel(%arg0: memref<1x12xf32, #tpu.memory_space<vmem>>, %arg1: memref<12x12xf32, #tpu.memory_space<vmem>>, %arg2: memref<1x12xf32, #tpu.memory_space<vmem>>, %arg3: memref<1x12xf32, #tpu.memory_space<vmem>>) attributes {dimension_semantics = [], scalar_prefetch = 0 : i64, scratch_operands = 0 : i64, tpu.core_type = #tpu.core_type<tc>} {
    %c0 = arith.constant 0 : index
    %c0_0 = arith.constant 0 : index
    %0 = vector.load %arg0[%c0, %c0_0] : memref<1x12xf32, #tpu.memory_space<vmem>>, vector<1x12xf32>
    %c0_1 = arith.constant 0 : index
    %c0_2 = arith.constant 0 : index
    %1 = vector.load %arg1[%c0_1, %c0_2] : memref<12x12xf32, #tpu.memory_space<vmem>>, vector<12x12xf32>
    %cst = arith.constant dense<0.000000e+00> : vector<1x12xf32>
    %2 = tpu.matmul %0, %1, %cst {dimension_numbers = #tpu.dot_dimension_numbers<[1], [0], [0], [1], [0, 0, 1, 1], [], []>} : vector<1x12xf32>, vector<12x12xf32>, vector<1x12xf32> -> vector<1x12xf32>
    %c0_3 = arith.constant 0 : index
    %c0_4 = arith.constant 0 : index
    %3 = vector.load %arg2[%c0_3, %c0_4] : memref<1x12xf32, #tpu.memory_space<vmem>>, vector<1x12xf32>
    %4 = arith.addf %2, %3 : vector<1x12xf32>
    %cst_5 = arith.constant 0.000000e+00 : f32
    %cst_6 = arith.constant 6.000000e+00 : f32
    %5 = vector.broadcast %cst_5 : f32 to vector<1x12xf32>
    %6 = arith.maximumf %5, %4 : vector<1x12xf32>
    %7 = vector.broadcast %cst_6 : f32 to vector<1x12xf32>
    %8 = arith.minimumf %7, %6 : vector<1x12xf32>
    %cst_7 = arith.constant 0.166666672 : f32
    %9 = vector.broadcast %cst_7 : f32 to vector<1x12xf32>
    %10 = arith.mulf %8, %9 : vector<1x12xf32>
    %cst_8 = arith.constant 5.000000e-01 : f32
    %11 = vector.broadcast %cst_8 : f32 to vector<1x12xf32>
    %12 = arith.addf %10, %11 : vector<1x12xf32>
    %c0_9 = arith.constant 0 : index
    %c0_10 = arith.constant 0 : index
    %13 = vector.load %arg3[%c0_9, %c0_10] : memref<1x12xf32, #tpu.memory_space<vmem>>, vector<1x12xf32>
    tpu.vector_store %arg3[%c0_9, %c0_10], %12 {strides = array<i32>} : memref<1x12xf32, #tpu.memory_space<vmem>>, vector<1x12xf32>,
    return
  }
}

</mosaic_0001>

<bundles_post_ra>
// kernel: model_forward.1
= control target key start
LH: loop header
LB: loop body
LE: loop exit
PB: predicated region body
PF: predicated region fallthrough
CT: control target
= control target key end

     0   :  { %8 = vsyncpa [#allocation3], 0  ;;  %s262_s0 = inlined_call_operand.vmem [shape: f32[1,12], index: 0, kind: input, shape index: {}]   ;;  %s263_s1 = inlined_call_operand.hbm [shape: f32[12,12], index: 1, kind: input, shape index: {}]   ;;  %s264_s2 = inlined_call_operand.vmem [shape: f32[1,12], index: 2, kind: input, shape index: {}]   ;;  %s265_s3 = inlined_call_operand.hbm [shape: f32[1,12], index: 3, kind: output, shape index: {}]  }
   0x1   :  { %9 = vsyncpa [#allocation4], 0  ;;  %s204_s12 = smov [#allocation2]   ;;  %s156_s16 = scalar_lea.hbm %s263_s1, 256 }
   0x2   :  { %s17_s13 = sshll.u32 %s204_s12, 4  ;;  %p157_p0 = scmp.ne.s32.totalorder %s263_s1, %s156_s16  ;;  %s18_s13 = int_to_ptr.vmem [resolvable:$true] %s17_s13 }
   0x3   :  { %p160_p1 = scmp.lt.u32.totalorder %s156_s16, %s263_s1 }
   0x5   :  { %p162_p2 = pnand %p160_p1, %p157_p0 }
   0x7   :  { %165 = shalt.err (!%p162_p2)
}
   0x8   :  { %s166_s21 = scalar_lea.vmem %s18_s13, 256  ;;  %p171_p4 = scmp.lt.s32.totalorder %s18_s13, %s18_s13 }
   0x9   :  { %p167_p3 = scmp.ne.s32.totalorder %s18_s13, %s166_s21  ;;  %p172_p5 = scmp.lt.s32.totalorder %s166_s21, %s166_s21 }
   0xb   :  { %p173_p6 = por %p172_p5, %p171_p4 }
   0xd   :  { %p174_p7 = pnand %p173_p6, %p167_p3 }
   0xf   :  { %177 = shalt.err (!%p174_p7)
}
  0x10   :  { %s205_s22 = smov 128   ;;  %s206_s23 = smov 8  }
  0x11   :  { %23 = dma.hbm_to_vmem [thread:$0]  %s263_s1, 256, %s18_s13, [#allocation3], %s205_s22, %s205_s22, %s206_s23  }
  0x12   :  { %200 = dma.done.wait [#allocation3], 256  }
  0x13   :  { %201 = vsyncadd [#allocation3], 4294967040  ;;  %v207_v0 = vmov 0.0|0.0   ;;  %vm208_vm0 = vmmov 0   ;;  %v209_v1 = vmov 0.0   ;;  %vm37_vm1 = vcmask 1043456  }
  0x14   :  { %144 = vmatprep.subr.bf16.mxu0 %v207_v0  ;;  %141 = vmatprep.mubr.msk.f32.mxu0 %vm208_vm0, %v209_v1  ;;  %v30_v2 = vld [vmem:[#allocation2] sm:$0xff]  ;;  %v31_v3 = vld [vmem:[#allocation2 + $0x8] sm:$0xf]  ;;  %vm210_vm2 = vmmov 1   ;;  %vm33_vm4 = vcmask 97280   ;;  %s211_s29 = smov [#allocation5]  }
  0x15   :  { %vm146_vm3 = vmpackc.low %vm37_vm1, %vm210_vm2  ;;  %v145_v4 = vpack.c.bf16 %v31_v3, %v30_v2  ;;  %v29_v5 = vld [vmem:[%s262_s0] sm:$0x1]  ;;  %s123_s30 = sshll.u32 %s211_s29, 4  ;;  %vm115_vm5 = vcmask 90112   ;;  %s124_s30 = int_to_ptr.vmem [resolvable:$true] %s123_s30 }
  0x16   :  { %v32_v6 = vld [vmem:[%s264_s2] sm:$0x1]  ;;  %s178_s4 = scalar_lea.vmem %s124_s30, 16  ;;  %s182_s0 = scalar_lea.vmem %s124_s30, 32 }
  0x17   :  { %147 = vmatpush3.bf16.msk.msra.mxu0 %vm146_vm3, %v145_v4  ;;  %p179_p8 = scmp.ne.s32.totalorder %s124_s30, %s178_s4  ;;  %p183_p9 = scmp.lt.s32.totalorder %s124_s30, %s124_s30 }
  0x18   :  { %p184_p10 = scmp.lt.s32.totalorder %s182_s0, %s178_s4 }
  0x1a   :  { %142 = vmatmul.mubr.msk.f32.vlgmr.msra.gmra.mrb[0].mxu0 %vm33_vm4, %v29_v5  ;;  %p185_p11 = por %p184_p10, %p183_p9 }
  0x1c   :  { %p186_p12 = pnand %p185_p11, %p179_p8 }
  0xed   :  { %v107_v7 = vpop.f32.mrb[0].mxu0 }
  0xee   :  { %v108_v8 = vadd.f32 %v107_v7, %v32_v6  ;;  %v143_v9 = vpop.f32.mrb[1].mxu0 }
  0xf0   :  { %v111_v10 = vmax.f32 %v108_v8, 0.0 }
  0xf2   :  { %v112_v11 = vmin.f32 %v111_v10, 6.0 }
  0xf4   :  { %v113_v12 = vmul.f32 0.16666667, %v112_v11 }
  0xf6   :  { %v114_v13 = vadd.f32 0.5, %v113_v12 }
  0xf8   :  { %116 = vst.msk [vmem:[#allocation5] sm:$0x1] %vm115_vm5, %v114_v13 }
  0xf9   :  { %189 = shalt.err (!%p186_p12)
}
  0xfa   :  { %s190_s6 = scalar_lea.hbm %s265_s3, 16 }
  0xfb   :  { %p191_p13 = scmp.ne.s32.totalorder %s265_s3, %s190_s6  ;;  %p194_p0 = scmp.lt.u32.totalorder %s190_s6, %s265_s3 }
  0xfd   :  { %p196_p1 = pnand %p194_p0, %p191_p13 }
  0xff   :  { %199 = shalt.err (!%p196_p1)
}
 0x100   :  { %126 = dma.vmem_to_hbm [thread:$0]  %s124_s30, 16, %s265_s3, [#allocation4]  }
 0x101   :  { %202 = dma.done.wait [#allocation4], 16  }
 0x102   :  { %203 = vsyncadd [#allocation4], 4294967280 }
 0x103   :  { %130 = vsyncpa [#allocation3], 1 }
 0x104   :  { %131 = vsyncpa [#allocation4], 1 }

</bundles_post_ra>
